<compile_context>
chip_gen: v5e
topology: v5e:2x2
jax: 0.10.0
libtpu: 0.0.40
codegen_flags: <defaults>
</compile_context>

<pallas_src>
import math

import jax
import jax.numpy as jnp
from jax.experimental import pallas as pl
from jax.experimental.pallas import tpu as pltpu


# ----------------------------------------------------------------------------
# Pallas kernel: one WaveRNN dual-softmax GRU-like step for a batch tile at
# time step t = program_id(1).  hidden_ref has a constant block index along
# the time axis, so it stays resident in VMEM and doubles as the recurrent
# carry; weights are resident for the whole grid.
# ----------------------------------------------------------------------------
def wavernn_step_kernel(fine_ref, h0_ref,
                        wR_ref, wI_ref, bg_ref,
                        wA_ref, bA_ref, wB_ref, bB_ref,
                        out_ref, hidden_ref):
    H = hidden_ref.shape[1]
    t = pl.program_id(1)

    @pl.when(t == 0)
    def _():
        hidden_ref[...] = h0_ref[...]

    prev_h = hidden_ref[...]                       # (TB, H) f32 carry
    fi = fine_ref[0]                               # (TB, 3) = [prev_y, coarse]

    # Recurrent projection on the MXU: bf16 x bf16 -> f32 accumulate.
    R = jnp.dot(prev_h.astype(jnp.bfloat16), wR_ref[...],
                preferred_element_type=jnp.float32)            # (TB, 3H)

    # Input projections have K = 3 -> explicit broadcast sums on the VPU
    # instead of a padded MXU matmul.  wI already produces the concatenated
    # [coarse | fine] column order for each gate, full H wide.
    wI = wI_ref[...]                               # (3, 3H)
    Iproj = (fi[:, 0:1] * wI[0:1, :]
             + fi[:, 1:2] * wI[1:2, :]
             + fi[:, 2:3] * wI[2:3, :])            # (TB, 3H)
    pre = Iproj + bg_ref[...]                      # + [bias_u|bias_r|bias_e]

    # Full-width gate math (no sub-lane S-slicing).
    u = jax.nn.sigmoid(R[:, 0:H] + pre[:, 0:H])
    r = jax.nn.sigmoid(R[:, H:2 * H] + pre[:, H:2 * H])
    e = jnp.tanh(r * R[:, 2 * H:3 * H] + pre[:, 2 * H:3 * H])

    h_new = u * prev_h + (1.0 - u) * e             # (TB, H)
    hidden_ref[...] = h_new                        # single full-width store

    # Fused output heads: block-diagonal O1/O3 then O2/O4.  Two MXU matmuls
    # and a single lane-dense (TB, 2Q) store.
    a = jnp.maximum(
        jnp.dot(h_new.astype(jnp.bfloat16), wA_ref[...],
                preferred_element_type=jnp.float32) + bA_ref[...], 0.0)
    out = jnp.dot(a.astype(jnp.bfloat16), wB_ref[...],
                  preferred_element_type=jnp.float32) + bB_ref[...]
    out_ref[0] = out                               # (TB, 2Q) lane-dense


# ----------------------------------------------------------------------------
# Wrapper: T teacher-forced steps in ONE pallas_call, weights resident.
# ----------------------------------------------------------------------------
# TODO(synk): true generation-time decoding (sampling the next prev_y /
# current_coarse from the output logits) is not part of the module's forward();
# that sampling step would also be hoisted into this kernel for inference.
def wavernn_forward_sequence(fine_seq, h0, params, *, batch_tile=None):
    """fine_seq: (T, B, 3) per-step [prev_y(2), current_coarse(1)] inputs.
    h0: (B, H) initial hidden.  Returns (out_cf, hidden_final) where
    out_cf is (T, B, 2Q): out_coarse = out_cf[..., :Q], out_fine = [..., Q:]."""
    T, B, f = fine_seq.shape
    assert f == 3
    Bh, H = h0.shape
    assert Bh == B and H % 2 == 0
    twoQ = params['wB'].shape[1]

    TB = batch_tile if batch_tile is not None else min(B, 256)
    assert B % TB == 0 and (TB == B or TB % 8 == 0), (B, TB)
    n_b = B // TB

    wR, wI, bg = params['wR'], params['wI'], params['b_gates']
    wA, bA, wB, bB = params['wA'], params['bA'], params['wB'], params['bB']

    def const2d(arr):  # weights / biases: constant block index -> resident
        return pl.BlockSpec(arr.shape, lambda b, t: (0, 0))

    in_specs = [
        pl.BlockSpec((1, TB, 3), lambda b, t: (t, b, 0)),        # fine_seq
        pl.BlockSpec((TB, H), lambda b, t: (b, 0)),              # h0
        const2d(wR), const2d(wI), const2d(bg),
        const2d(wA), const2d(bA), const2d(wB), const2d(bB),
    ]
    out_specs = (
        pl.BlockSpec((1, TB, twoQ), lambda b, t: (t, b, 0)),     # out_cf
        pl.BlockSpec((TB, H), lambda b, t: (b, 0)),              # hidden carry
    )
    out_shape = (jax.ShapeDtypeStruct((T, B, twoQ), jnp.float32),
                 jax.ShapeDtypeStruct((B, H), jnp.float32))

    # Explicit VMEM budget: resident weights + (double-buffered) activations.
    weight_bytes = sum(int(a.nbytes) for a in (wR, wI, bg, wA, bA, wB, bB))
    act_bytes = 4 * TB * (3 + 2 * H + twoQ) * 4
    vmem_limit = int(min(max(2 * weight_bytes + act_bytes + (4 << 20),
                             32 << 20), 100 << 20))

    fn = pl.pallas_call(
        wavernn_step_kernel,
        grid=(n_b, T),                 # sequential (carry) time axis last
        in_specs=in_specs,
        out_specs=out_specs,
        out_shape=out_shape,
        compiler_params=pltpu.CompilerParams(
            dimension_semantics=("parallel", "arbitrary"),
            vmem_limit_bytes=vmem_limit),
    )
    return fn(fine_seq, h0, wR, wI, bg, wA, bA, wB, bB)


def wavernn_forward(prev_y, prev_hidden, current_coarse, params, *,
                    batch_tile=None):
    """Single WaveRNN.forward step -> (out_coarse, out_fine, hidden)."""
    Q = params['wB'].shape[1] // 2
    fine_input = jnp.concatenate([prev_y, current_coarse], axis=1)   # (B, 3)
    out_cf, hidden = wavernn_forward_sequence(
        fine_input[None], prev_hidden, params, batch_tile=batch_tile)
    out_cf = out_cf[0]
    return out_cf[:, :Q], out_cf[:, Q:], hidden


# ----------------------------------------------------------------------------
# Parameter init (raw, matches WaveRNN.__init__ shapes, transposed) + fusion
# into the kernel layout (bf16 matmul weights, block-diagonal output heads,
# combined gate-major input-projection / bias tensors).
# ----------------------------------------------------------------------------
def init_params(key, hidden_size, quantisation):
    S = hidden_size // 2
    ks = jax.random.split(key, 16)

    def lin_w(k, fan_in, fan_out):
        bound = 1.0 / math.sqrt(fan_in)
        return jax.random.uniform(k, (fan_in, fan_out), jnp.float32,
                                  -bound, bound)

    def lin_b(k, fan_in, fan_out):
        bound = 1.0 / math.sqrt(fan_in)
        return jax.random.uniform(k, (1, fan_out), jnp.float32, -bound, bound)

    # Gate biases are zeros in __init__; small random values here so the
    # bias-add path is actually exercised.
    return {
        'wR':  lin_w(ks[0], hidden_size, 3 * hidden_size),
        'wIc': lin_w(ks[1], 2, 3 * S),
        'wIf': lin_w(ks[2], 3, 3 * S),
        'wO1': lin_w(ks[3], S, S), 'bO1': lin_b(ks[4], S, S),
        'wO2': lin_w(ks[5], S, quantisation), 'bO2': lin_b(ks[6], S, quantisation),
        'wO3': lin_w(ks[7], S, S), 'bO3': lin_b(ks[8], S, S),
        'wO4': lin_w(ks[9], S, quantisation), 'bO4': lin_b(ks[10], S, quantisation),
        'bu': 0.1 * jax.random.normal(ks[11], (1, hidden_size), jnp.float32),
        'br': 0.1 * jax.random.normal(ks[12], (1, hidden_size), jnp.float32),
        'be': 0.1 * jax.random.normal(ks[13], (1, hidden_size), jnp.float32),
    }


def fuse_params(raw, hidden_size, quantisation):
    H, S, Q = hidden_size, hidden_size // 2, quantisation

    # Combined input projection (3, 3H): per gate g the columns are
    # [coarse-half (from wIc, coarse row zero) | fine-half (from wIf)],
    # matching the torch.cat([I_coarse_x, I_fine_x], dim=1) layout.
    wIc, wIf = raw['wIc'], raw['wIf']              # (2, 3S), (3, 3S)
    wI = jnp.zeros((3, 3 * H), jnp.float32)
    for g in range(3):
        wI = wI.at[0:2, g * H:g * H + S].set(wIc[:, g * S:(g + 1) * S])
        wI = wI.at[:, g * H + S:(g + 1) * H].set(wIf[:, g * S:(g + 1) * S])

    b_gates = jnp.concatenate([raw['bu'], raw['br'], raw['be']], axis=1)

    # Block-diagonal fused output heads.
    wA = jnp.zeros((H, H), jnp.float32)
    wA = wA.at[:S, :S].set(raw['wO1']).at[S:, S:].set(raw['wO3'])
    bA = jnp.concatenate([raw['bO1'], raw['bO3']], axis=1)           # (1, H)
    wB = jnp.zeros((H, 2 * Q), jnp.float32)
    wB = wB.at[:S, :Q].set(raw['wO2']).at[S:, Q:].set(raw['wO4'])
    bB = jnp.concatenate([raw['bO2'], raw['bO4']], axis=1)           # (1, 2Q)

    return {
        'wR': raw['wR'].astype(jnp.bfloat16),      # MXU weights in bf16
        'wI': wI,                                  # VPU weight stays f32
        'b_gates': b_gates,
        'wA': wA.astype(jnp.bfloat16), 'bA': bA,
        'wB': wB.astype(jnp.bfloat16), 'bB': bB,
    }


# ----------------------------------------------------------------------------
# Pure-JAX f32 references mirroring the PyTorch forward exactly.
# ----------------------------------------------------------------------------
def reference_forward(prev_y, prev_hidden, current_coarse, raw):
    R_hidden = prev_hidden @ raw['wR']
    R_u, R_r, R_e = jnp.split(R_hidden, 3, axis=1)
    Ic = prev_y @ raw['wIc']
    Icu, Icr, Ice = jnp.split(Ic, 3, axis=1)
    fine_input = jnp.concatenate([prev_y, current_coarse], axis=1)
    If = fine_input @ raw['wIf']
    Ifu, Ifr, Ife = jnp.split(If, 3, axis=1)
    I_u = jnp.concatenate([Icu, Ifu], axis=1)
    I_r = jnp.concatenate([Icr, Ifr], axis=1)
    I_e = jnp.concatenate([Ice, Ife], axis=1)
    u = jax.nn.sigmoid(R_u + I_u + raw['bu'])
    r = jax.nn.sigmoid(R_r + I_r + raw['br'])
    e = jnp.tanh(r * R_e + I_e + raw['be'])
    hidden = u * prev_hidden + (1.0 - u) * e
    hc, hf = jnp.split(hidden, 2, axis=1)
    out_c = jnp.maximum(hc @ raw['wO1'] + raw['bO1'], 0.0) @ raw['wO2'] + raw['bO2']
    out_f = jnp.maximum(hf @ raw['wO3'] + raw['bO3'], 0.0) @ raw['wO4'] + raw['bO4']
    return out_c, out_f, hidden


def reference_sequence(fine_seq, h0, raw):
    outs, h = [], h0
    for t in range(fine_seq.shape[0]):
        py = fine_seq[t, :, 0:2]
        cc = fine_seq[t, :, 2:3]
        oc, of, h = reference_forward(py, h, cc, raw)
        outs.append(jnp.concatenate([oc, of], axis=1))
    return jnp.stack(outs, axis=0), h


if __name__ == "__main__":
    # Small shapes consistent with the module's forward:
    #   prev_y: (B, 2), prev_hidden: (B, H), current_coarse: (B, 1)
    B, H, Q, T = 16, 64, 64, 8

    key = jax.random.PRNGKey(0)
    kp, k1, k2, k3, k4 = jax.random.split(key, 5)
    raw = init_params(kp, H, Q)
    params = fuse_params(raw, H, Q)

    prev_y = jax.random.uniform(k1, (B, 2), jnp.float32)
    prev_hidden = 0.5 * jax.random.normal(k2, (B, H), jnp.float32)
    current_coarse = jax.random.uniform(k3, (B, 1), jnp.float32)

    # --- single forward step (matches WaveRNN.forward) ---
    out_c, out_f, hidden = jax.block_until_ready(
        wavernn_forward(prev_y, prev_hidden, current_coarse, params))
    ref_c, ref_f, ref_h = reference_forward(prev_y, prev_hidden,
                                            current_coarse, raw)
    assert out_c.shape == (B, Q) and out_f.shape == (B, Q)
    assert hidden.shape == (B, H)
    # bf16 matmul weights in the kernel vs f32 reference -> relaxed tolerance.
    assert jnp.allclose(out_c, ref_c, atol=2e-2, rtol=2e-2)
    assert jnp.allclose(out_f, ref_f, atol=2e-2, rtol=2e-2)
    assert jnp.allclose(hidden, ref_h, atol=2e-2, rtol=2e-2)

    # --- T teacher-forced steps in one pallas_call (weights stay resident) ---
    fine_seq = jax.random.uniform(k4, (T, B, 3), jnp.float32)
    out_cf_seq, h_final = jax.block_until_ready(
        wavernn_forward_sequence(fine_seq, prev_hidden, params))
    ref_cf_seq, ref_hT = reference_sequence(fine_seq, prev_hidden, raw)
    assert out_cf_seq.shape == (T, B, 2 * Q) and h_final.shape == (B, H)
    assert jnp.allclose(out_cf_seq, ref_cf_seq, atol=3e-2, rtol=3e-2)
    assert jnp.allclose(h_final, ref_hT, atol=3e-2, rtol=3e-2)

    print("KERNEL_OK")
</pallas_src>

<mosaic_0001>
module attributes {stable_mosaic.version = 11 : i64} {
  func.func @wavernn_step_kernel(%arg0: i32, %arg1: i32, %arg2: memref<1x16x3xf32, #tpu.memory_space<vmem>>, %arg3: memref<16x64xf32, #tpu.memory_space<vmem>>, %arg4: memref<64x192xbf16, #tpu.memory_space<vmem>>, %arg5: memref<3x192xf32, #tpu.memory_space<vmem>>, %arg6: memref<1x192xf32, #tpu.memory_space<vmem>>, %arg7: memref<64x64xbf16, #tpu.memory_space<vmem>>, %arg8: memref<1x64xf32, #tpu.memory_space<vmem>>, %arg9: memref<64x128xbf16, #tpu.memory_space<vmem>>, %arg10: memref<1x128xf32, #tpu.memory_space<vmem>>, %arg11: memref<1x16x128xf32, #tpu.memory_space<vmem>>, %arg12: memref<16x64xf32, #tpu.memory_space<vmem>>) attributes {dimension_semantics = [#tpu.dimension_semantics<parallel>, #tpu.dimension_semantics<arbitrary>], iteration_bounds = array<i64: 1, 1>, scalar_prefetch = 0 : i64, scratch_operands = 0 : i64, tpu.core_type = #tpu.core_type<tc>, window_params = [{transform_indices = @transform_0, window_bounds = array<i64: 1, 16, 3>}, {transform_indices = @transform_1, window_bounds = array<i64: 16, 64>}, {pipeline_mode = #tpu.pipeline_mode<synchronous>, transform_indices = @transform_2, window_bounds = array<i64: 64, 192>}, {pipeline_mode = #tpu.pipeline_mode<synchronous>, transform_indices = @transform_3, window_bounds = array<i64: 3, 192>}, {pipeline_mode = #tpu.pipeline_mode<synchronous>, transform_indices = @transform_4, window_bounds = array<i64: 1, 192>}, {pipeline_mode = #tpu.pipeline_mode<synchronous>, transform_indices = @transform_5, window_bounds = array<i64: 64, 64>}, {pipeline_mode = #tpu.pipeline_mode<synchronous>, transform_indices = @transform_6, window_bounds = array<i64: 1, 64>}, {pipeline_mode = #tpu.pipeline_mode<synchronous>, transform_indices = @transform_7, window_bounds = array<i64: 64, 128>}, {pipeline_mode = #tpu.pipeline_mode<synchronous>, transform_indices = @transform_8, window_bounds = array<i64: 1, 128>}, {transform_indices = @transform_9, window_bounds = array<i64: 1, 16, 128>}, {transform_indices = @transform_10, window_bounds = array<i64: 16, 64>}]} {
    %c0_i32 = arith.constant 0 : i32
    %0 = arith.cmpi eq, %arg1, %c0_i32 : i32
    %1 = arith.extui %0 : i1 to i32
    %c0_i32_0 = arith.constant 0 : i32
    %2 = arith.cmpi ne, %1, %c0_i32_0 : i32
    scf.if %2 {
      %c0_30 = arith.constant 0 : index
      %c0_31 = arith.constant 0 : index
      %74 = vector.load %arg3[%c0_30, %c0_31] : memref<16x64xf32, #tpu.memory_space<vmem>>, vector<16x64xf32>
      %c0_32 = arith.constant 0 : index
      %c0_33 = arith.constant 0 : index
      %75 = vector.load %arg12[%c0_32, %c0_33] : memref<16x64xf32, #tpu.memory_space<vmem>>, vector<16x64xf32>
      tpu.vector_store %arg12[%c0_32, %c0_33], %74 {strides = array<i32>} : memref<16x64xf32, #tpu.memory_space<vmem>>, vector<16x64xf32>,
    } else {
    }
    %c0 = arith.constant 0 : index
    %c0_1 = arith.constant 0 : index
    %3 = vector.load %arg12[%c0, %c0_1] : memref<16x64xf32, #tpu.memory_space<vmem>>, vector<16x64xf32>
    %c0_2 = arith.constant 0 : index
    %c0_3 = arith.constant 0 : index
    %c0_4 = arith.constant 0 : index
    %4 = vector.load %arg2[%c0_2, %c0_3, %c0_4] : memref<1x16x3xf32, #tpu.memory_space<vmem>>, vector<1x16x3xf32>
    %5 = vector.shape_cast %4 : vector<1x16x3xf32> to vector<16x3xf32>
    %6 = arith.truncf %3 : vector<16x64xf32> to vector<16x64xbf16>
    %c0_5 = arith.constant 0 : index
    %c0_6 = arith.constant 0 : index
    %7 = vector.load %arg4[%c0_5, %c0_6] : memref<64x192xbf16, #tpu.memory_space<vmem>>, vector<64x192xbf16>
    %cst = arith.constant dense<0.000000e+00> : vector<16x192xf32>
    %8 = tpu.matmul %6, %7, %cst {dimension_numbers = #tpu.dot_dimension_numbers<[1], [0], [0], [1], [0, 0, 1, 1], [], []>} : vector<16x64xbf16>, vector<64x192xbf16>, vector<16x192xf32> -> vector<16x192xf32>
    %c0_7 = arith.constant 0 : index
    %c0_8 = arith.constant 0 : index
    %9 = vector.load %arg5[%c0_7, %c0_8] : memref<3x192xf32, #tpu.memory_space<vmem>>, vector<3x192xf32>
    %10 = vector.extract_strided_slice %5 {offsets = [0, 0], sizes = [16, 1], strides = [1, 1]} : vector<16x3xf32> to vector<16x1xf32>
    %11 = vector.extract_strided_slice %9 {offsets = [0, 0], sizes = [1, 192], strides = [1, 1]} : vector<3x192xf32> to vector<1x192xf32>
    %12 = vector.broadcast %10 : vector<16x1xf32> to vector<16x192xf32>
    %13 = vector.broadcast %11 : vector<1x192xf32> to vector<16x192xf32>
    %14 = arith.mulf %12, %13 : vector<16x192xf32>
    %15 = vector.extract_strided_slice %5 {offsets = [0, 1], sizes = [16, 1], strides = [1, 1]} : vector<16x3xf32> to vector<16x1xf32>
    %16 = vector.extract_strided_slice %9 {offsets = [1, 0], sizes = [1, 192], strides = [1, 1]} : vector<3x192xf32> to vector<1x192xf32>
    %17 = vector.broadcast %15 : vector<16x1xf32> to vector<16x192xf32>
    %18 = vector.broadcast %16 : vector<1x192xf32> to vector<16x192xf32>
    %19 = arith.mulf %17, %18 : vector<16x192xf32>
    %20 = arith.addf %14, %19 : vector<16x192xf32>
    %21 = vector.extract_strided_slice %5 {offsets = [0, 2], sizes = [16, 1], strides = [1, 1]} : vector<16x3xf32> to vector<16x1xf32>
    %22 = vector.extract_strided_slice %9 {offsets = [2, 0], sizes = [1, 192], strides = [1, 1]} : vector<3x192xf32> to vector<1x192xf32>
    %23 = vector.broadcast %21 : vector<16x1xf32> to vector<16x192xf32>
    %24 = vector.broadcast %22 : vector<1x192xf32> to vector<16x192xf32>
    %25 = arith.mulf %23, %24 : vector<16x192xf32>
    %26 = arith.addf %20, %25 : vector<16x192xf32>
    %c0_9 = arith.constant 0 : index
    %c0_10 = arith.constant 0 : index
    %27 = vector.load %arg6[%c0_9, %c0_10] : memref<1x192xf32, #tpu.memory_space<vmem>>, vector<1x192xf32>
    %28 = vector.broadcast %27 : vector<1x192xf32> to vector<16x192xf32>
    %29 = arith.addf %26, %28 : vector<16x192xf32>
    %30 = vector.extract_strided_slice %8 {offsets = [0, 0], sizes = [16, 64], strides = [1, 1]} : vector<16x192xf32> to vector<16x64xf32>
    %31 = vector.extract_strided_slice %29 {offsets = [0, 0], sizes = [16, 64], strides = [1, 1]} : vector<16x192xf32> to vector<16x64xf32>
    %32 = arith.addf %30, %31 : vector<16x64xf32>
    %33 = arith.negf %32 : vector<16x64xf32>
    %34 = math.exp %33 : vector<16x64xf32>
    %cst_11 = arith.constant 1.000000e+00 : f32
    %35 = vector.broadcast %cst_11 : f32 to vector<16x64xf32>
    %36 = arith.addf %35, %34 : vector<16x64xf32>
    %37 = arith.divf %35, %36 : vector<16x64xf32>
    %38 = vector.extract_strided_slice %8 {offsets = [0, 64], sizes = [16, 64], strides = [1, 1]} : vector<16x192xf32> to vector<16x64xf32>
    %39 = vector.extract_strided_slice %29 {offsets = [0, 64], sizes = [16, 64], strides = [1, 1]} : vector<16x192xf32> to vector<16x64xf32>
    %40 = arith.addf %38, %39 : vector<16x64xf32>
    %41 = arith.negf %40 : vector<16x64xf32>
    %42 = math.exp %41 : vector<16x64xf32>
    %cst_12 = arith.constant 1.000000e+00 : f32
    %43 = vector.broadcast %cst_12 : f32 to vector<16x64xf32>
    %44 = arith.addf %43, %42 : vector<16x64xf32>
    %45 = arith.divf %43, %44 : vector<16x64xf32>
    %46 = vector.extract_strided_slice %8 {offsets = [0, 128], sizes = [16, 64], strides = [1, 1]} : vector<16x192xf32> to vector<16x64xf32>
    %47 = arith.mulf %45, %46 : vector<16x64xf32>
    %48 = vector.extract_strided_slice %29 {offsets = [0, 128], sizes = [16, 64], strides = [1, 1]} : vector<16x192xf32> to vector<16x64xf32>
    %49 = arith.addf %47, %48 : vector<16x64xf32>
    %50 = math.tanh %49 : vector<16x64xf32>
    %51 = arith.mulf %37, %3 : vector<16x64xf32>
    %cst_13 = arith.constant 1.000000e+00 : f32
    %52 = vector.broadcast %cst_13 : f32 to vector<16x64xf32>
    %53 = arith.subf %52, %37 : vector<16x64xf32>
    %54 = arith.mulf %53, %50 : vector<16x64xf32>
    %55 = arith.addf %51, %54 : vector<16x64xf32>
    %c0_14 = arith.constant 0 : index
    %c0_15 = arith.constant 0 : index
    %56 = vector.load %arg12[%c0_14, %c0_15] : memref<16x64xf32, #tpu.memory_space<vmem>>, vector<16x64xf32>
    tpu.vector_store %arg12[%c0_14, %c0_15], %55 {strides = array<i32>} : memref<16x64xf32, #tpu.memory_space<vmem>>, vector<16x64xf32>,
    %57 = arith.truncf %55 : vector<16x64xf32> to vector<16x64xbf16>
    %c0_16 = arith.constant 0 : index
    %c0_17 = arith.constant 0 : index
    %58 = vector.load %arg7[%c0_16, %c0_17] : memref<64x64xbf16, #tpu.memory_space<vmem>>, vector<64x64xbf16>
    %cst_18 = arith.constant dense<0.000000e+00> : vector<16x64xf32>
    %59 = tpu.matmul %57, %58, %cst_18 {dimension_numbers = #tpu.dot_dimension_numbers<[1], [0], [0], [1], [0, 0, 1, 1], [], []>} : vector<16x64xbf16>, vector<64x64xbf16>, vector<16x64xf32> -> vector<16x64xf32>
    %c0_19 = arith.constant 0 : index
    %c0_20 = arith.constant 0 : index
    %60 = vector.load %arg8[%c0_19, %c0_20] : memref<1x64xf32, #tpu.memory_space<vmem>>, vector<1x64xf32>
    %61 = vector.broadcast %60 : vector<1x64xf32> to vector<16x64xf32>
    %62 = arith.addf %59, %61 : vector<16x64xf32>
    %cst_21 = arith.constant 0.000000e+00 : f32
    %63 = vector.broadcast %cst_21 : f32 to vector<16x64xf32>
    %64 = arith.maximumf %62, %63 : vector<16x64xf32>
    %65 = arith.truncf %64 : vector<16x64xf32> to vector<16x64xbf16>
    %c0_22 = arith.constant 0 : index
    %c0_23 = arith.constant 0 : index
    %66 = vector.load %arg9[%c0_22, %c0_23] : memref<64x128xbf16, #tpu.memory_space<vmem>>, vector<64x128xbf16>
    %cst_24 = arith.constant dense<0.000000e+00> : vector<16x128xf32>
    %67 = tpu.matmul %65, %66, %cst_24 {dimension_numbers = #tpu.dot_dimension_numbers<[1], [0], [0], [1], [0, 0, 1, 1], [], []>} : vector<16x64xbf16>, vector<64x128xbf16>, vector<16x128xf32> -> vector<16x128xf32>
    %c0_25 = arith.constant 0 : index
    %c0_26 = arith.constant 0 : index
    %68 = vector.load %arg10[%c0_25, %c0_26] : memref<1x128xf32, #tpu.memory_space<vmem>>, vector<1x128xf32>
    %69 = vector.broadcast %68 : vector<1x128xf32> to vector<16x128xf32>
    %70 = arith.addf %67, %69 : vector<16x128xf32>
    %c0_27 = arith.constant 0 : index
    %c0_28 = arith.constant 0 : index
    %c0_29 = arith.constant 0 : index
    %71 = vector.load %arg11[%c0_27, %c0_28, %c0_29] : memref<1x16x128xf32, #tpu.memory_space<vmem>>, vector<1x16x128xf32>
    %72 = vector.shape_cast %71 : vector<1x16x128xf32> to vector<16x128xf32>
    %73 = vector.shape_cast %70 : vector<16x128xf32> to vector<1x16x128xf32>
    tpu.vector_store %arg11[%c0_27, %c0_28, %c0_29], %73 {strides = array<i32>} : memref<1x16x128xf32, #tpu.memory_space<vmem>>, vector<1x16x128xf32>,
    return
  }
  func.func @transform_0(%arg0: i32, %arg1: i32) -> (i32, i32, i32) {
    %c0_i32 = arith.constant 0 : i32
    %c0_i32_0 = arith.constant 0 : i32
    return %arg1, %arg0, %c0_i32 : i32, i32, i32
  }
  func.func @transform_1(%arg0: i32, %arg1: i32) -> (i32, i32) {
    %c0_i32 = arith.constant 0 : i32
    %c0_i32_0 = arith.constant 0 : i32
    return %arg0, %c0_i32 : i32, i32
  }
  func.func @transform_2(%arg0: i32, %arg1: i32) -> (i32, i32) {
    %c0_i32 = arith.constant 0 : i32
    %c0_i32_0 = arith.constant 0 : i32
    %c0_i32_1 = arith.constant 0 : i32
    return %c0_i32, %c0_i32_0 : i32, i32
  }
  func.func @transform_3(%arg0: i32, %arg1: i32) -> (i32, i32) {
    %c0_i32 = arith.constant 0 : i32
    %c0_i32_0 = arith.constant 0 : i32
    %c0_i32_1 = arith.constant 0 : i32
    return %c0_i32, %c0_i32_0 : i32, i32
  }
  func.func @transform_4(%arg0: i32, %arg1: i32) -> (i32, i32) {
    %c0_i32 = arith.constant 0 : i32
    %c0_i32_0 = arith.constant 0 : i32
    %c0_i32_1 = arith.constant 0 : i32
    return %c0_i32, %c0_i32_0 : i32, i32
  }
  func.func @transform_5(%arg0: i32, %arg1: i32) -> (i32, i32) {
    %c0_i32 = arith.constant 0 : i32
    %c0_i32_0 = arith.constant 0 : i32
    %c0_i32_1 = arith.constant 0 : i32
    return %c0_i32, %c0_i32_0 : i32, i32
  }
  func.func @transform_6(%arg0: i32, %arg1: i32) -> (i32, i32) {
    %c0_i32 = arith.constant 0 : i32
    %c0_i32_0 = arith.constant 0 : i32
    %c0_i32_1 = arith.constant 0 : i32
    return %c0_i32, %c0_i32_0 : i32, i32
  }
  func.func @transform_7(%arg0: i32, %arg1: i32) -> (i32, i32) {
    %c0_i32 = arith.constant 0 : i32
    %c0_i32_0 = arith.constant 0 : i32
    %c0_i32_1 = arith.constant 0 : i32
    return %c0_i32, %c0_i32_0 : i32, i32
  }
  func.func @transform_8(%arg0: i32, %arg1: i32) -> (i32, i32) {
    %c0_i32 = arith.constant 0 : i32
    %c0_i32_0 = arith.constant 0 : i32
    %c0_i32_1 = arith.constant 0 : i32
    return %c0_i32, %c0_i32_0 : i32, i32
  }
  func.func @transform_9(%arg0: i32, %arg1: i32) -> (i32, i32, i32) {
    %c0_i32 = arith.constant 0 : i32
    %c0_i32_0 = arith.constant 0 : i32
    return %arg1, %arg0, %c0_i32 : i32, i32, i32
  }
  func.func @transform_10(%arg0: i32, %arg1: i32) -> (i32, i32) {
    %c0_i32 = arith.constant 0 : i32
    %c0_i32_0 = arith.constant 0 : i32
    return %arg0, %c0_i32 : i32, i32
  }
}

</mosaic_0001>

<bundles_post_ra>
// kernel: tpu_custom_call.1
= control target key start
LH: loop header
LB: loop body
LE: loop exit
PB: predicated region body
PF: predicated region fallthrough
CT: control target
= control target key end

     0   :  { %16 = vsyncpa [#allocation3], 0  ;;  %s912_s0 = inlined_call_operand.vmem [shape: f32[1,16,3], index: 0, kind: input, shape index: {}]   ;;  %s913_s1 = inlined_call_operand.vmem [shape: f32[16,64], index: 1, kind: input, shape index: {}]   ;;  %s914_s2 = inlined_call_operand.hbm [shape: bf16[64,192], index: 2, kind: input, shape index: {}]   ;;  %s915_s3 = inlined_call_operand.hbm [shape: f32[3,192], index: 3, kind: input, shape index: {}]   ;;  %s916_s4 = inlined_call_operand.vmem [shape: f32[1,192], index: 4, kind: input, shape index: {}]   ;;  %s917_s5 = inlined_call_operand.hbm [shape: bf16[64,64], index: 5, kind: input, shape index: {}]   ;;  %s918_s6 = inlined_call_operand.vmem [shape: f32[1,64], index: 6, kind: input, shape index: {}]   ;;  %s919_s7 = inlined_call_operand.hbm [shape: bf16[64,128], index: 7, kind: input, shape index: {}]   ;;  %s920_s8 = inlined_call_operand.vmem [shape: f32[1,128], index: 8, kind: input, shape index: {}]   ;;  %s921_s9 = inlined_call_operand.hbm [shape: f32[1,16,128], index: 9, kind: output, shape index: {0}]   ;;  %s922_s10 = inlined_call_operand.hbm [shape: f32[16,64], index: 10, kind: output, shape index: {1}]  }
   0x1   :  { %17 = vsyncpa [#allocation6], 0 }
   0x2   :  { %18 = vsyncpa [#allocation9], 0 }
   0x3   :  { %19 = vsyncpa [#allocation4], 0  ;;  %s43_s15 = sshll.u32 %s915_s3, 4  ;;  %s44_s15 = int_to_ptr.hbm [resolvable:$true] %s43_s15 }
   0x4   :  { %20 = vsyncpa [#allocation12], 0  ;;  %s770_s16 = smov [#allocation5]   ;;  %s29_s20 = sshll.u32 %s914_s2, 4  ;;  %s30_s20 = int_to_ptr.hbm [resolvable:$true] %s29_s20 }
   0x5   :  { %s45_s17 = sshll.u32 %s770_s16, 4  ;;  %s771_s21 = smov [#allocation2]   ;;  %s46_s17 = int_to_ptr.vmem [resolvable:$true] %s45_s17 }
   0x6   :  { %48 = dma.hbm_to_vmem [thread:$0]  %s44_s15, 128, %s46_s17, [#allocation6]  }
   0x7   :  { %s31_s22 = sshll.u32 %s771_s21, 4  ;;  %s772_s23 = smov 128   ;;  %s32_s22 = int_to_ptr.vmem [resolvable:$true] %s31_s22 }
   0x8   :  { %s773_s24 = smov 8   ;;  %s55_s26 = sshll.u32 %s917_s5, 4  ;;  %s56_s26 = int_to_ptr.hbm [resolvable:$true] %s55_s26 }
   0x9   :  { %37 = dma.hbm_to_vmem [thread:$0]  %s30_s20, 1024, %s32_s22, [#allocation3], %s772_s23, %s772_s23, %s773_s24  }
   0xa   :  { %s774_s27 = smov [#allocation7]   ;;  %s70_s30 = sshll.u32 %s919_s7, 4  ;;  %s71_s30 = int_to_ptr.hbm [resolvable:$true] %s70_s30 }
   0xb   :  { %s57_s28 = sshll.u32 %s774_s27, 4  ;;  %s775_s11 = smov 64   ;;  %s58_s28 = int_to_ptr.vmem [resolvable:$true] %s57_s28 }
   0xc   :  { %s776_s12 = smov 4   ;;  %s777_s13 = smov [#allocation8]  }
   0xd   :  { %63 = dma.hbm_to_vmem [thread:$0]  %s56_s26, 512, %s58_s28, [#allocation6], %s775_s11, %s775_s11, %s776_s12  }
   0xe   :  { %s72_s14 = sshll.u32 %s777_s13, 4  ;;  %s73_s14 = int_to_ptr.vmem [resolvable:$true] %s72_s14 }
   0xf   :  { %78 = dma.hbm_to_vmem [thread:$0]  %s71_s30, 512, %s73_s14, [#allocation9], %s775_s11, %s775_s11, %s776_s12  }
  0x10   :  { %760 = dma.done.wait [#allocation3], 1024  }
  0x11   :  { %761 = vsyncadd [#allocation3], 4294966272 }
  0x12   :  { %762 = dma.done.wait [#allocation6], 640  }
  0x13   :  { %763 = vsyncadd [#allocation6], 4294966656 }
  0x14   :  { %764 = dma.done.wait [#allocation9], 512  }
  0x15   :  { %765 = vsyncadd [#allocation9], 4294966784  ;;  %v778_v0 = vmov 1   ;;  %v779_v1 = vmov 0   ;;  %v780_v2 = vmov 2   ;;  %vm104_vm0 = vcmask 523264  }
  0x16   :  { %599 = vset.pattern.permute.xlu1 %v778_v0  ;;  %598 = vset.pattern.permute.xlu0 %v779_v1  ;;  %v525_v3 = vld [vmem:[#allocation2 + $0x30] sm:$0xf]  ;;  %v576_v4 = vld [vmem:[#allocation2 + $0x34] sm:$0xf0]  ;;  %v575_v5 = vld [vmem:[#allocation2 + $0x34] sm:$0xf] }
  0x17   :  { %600 = vset.pattern.permute.xlu2 %v780_v2  ;;  %v526_v6 = vor.u32 %v576_v4, %v525_v3  ;;  %v527_v7 = vld [vmem:[#allocation2 + $0x38] sm:$0xf0]  ;;  %v517_v8 = vld [vmem:[#allocation2 + $0x20] sm:$0xf]  ;;  %v574_v9 = vld [vmem:[#allocation2 + $0x24] sm:$0xf0] }
  0x18   :  { %v530_v10 = vor.u32 %v575_v5, %v527_v7  ;;  %v573_v11 = vld [vmem:[#allocation2 + $0x24] sm:$0xf]  ;;  %v519_v12 = vld [vmem:[#allocation2 + $0x28] sm:$0xf0]  ;;  %v518_v13 = vor.u32 %v574_v9, %v517_v8  ;;  %v509_v15 = vld [vmem:[#allocation2 + $0x10] sm:$0xf] }
  0x19   :  { %168 = vmatpush.bf16.msra.mxu0 %v526_v6  ;;  %v522_v14 = vor.u32 %v573_v11, %v519_v12  ;;  %v572_v16 = vld [vmem:[#allocation2 + $0x14] sm:$0xf0]  ;;  %v571_v17 = vld [vmem:[#allocation2 + $0x14] sm:$0xf]  ;;  %v511_v18 = vld [vmem:[#allocation2 + $0x18] sm:$0xf0] }
  0x1a   :  { %182 = vmatpush.bf16.msra.mxu1 %v530_v10  ;;  %v102_v19 = vld [vmem:[%s913_s1] sm:$0xff]  ;;  %v103_v20 = vld [vmem:[%s913_s1 + $0x8] sm:$0xff]  ;;  %v510_v22 = vor.u32 %v572_v16, %v509_v15  ;;  %v514_v23 = vor.u32 %v571_v17, %v511_v18  ;;  %s781_s22 = smov [#allocation11]   ;;  %s479_s27 = sshll.u32 %s922_s10, 4  ;;  %s480_s27 = int_to_ptr.hbm [resolvable:$true] %s479_s27 }
  0x1b   :  { %105 = vst.msk [vmem:[#allocation11] sm:$0xff] %vm104_vm0, %v102_v19  ;;  %v109_v21 = vld [vmem:[%s912_s0] sm:$0xff]  ;;  %v570_v25 = vld [vmem:[#allocation2 + $0x4] sm:$0xf0]  ;;  %v503_v27 = vld [vmem:[#allocation2 + $0x8] sm:$0xf0] }
  0x1c   :  { %106 = vst.msk [vmem:[#allocation11 + $0x8] sm:$0xff] %vm104_vm0, %v103_v20  ;;  %215 = vperm.xlu1 %599, %v109_v21   ;;  %v501_v24 = vld [vmem:[#allocation2] sm:$0xf]  ;;  %195 = vperm.xlu0 %598, %v109_v21   ;;  %v569_v26 = vld [vmem:[#allocation2 + $0x4] sm:$0xf]  ;;  %v110_v30 = vld [vmem:[%s912_s0 + $0x8] sm:$0xff] }
  0x1d   :  { %169 = vmatpush.bf16.msra.mxu0 %v518_v13  ;;  %237 = vperm.xlu2 %600, %v109_v21   ;;  %v502_v28 = vor.u32 %v570_v25, %v501_v24  ;;  %v506_v29 = vor.u32 %v569_v26, %v503_v27  ;;  %v192_v34 = vld [vmem:[#allocation5] sm:$0x77]  ;;  %s477_s3 = sshll.u32 %s781_s22, 4  ;;  %s782_s2 = smov [#allocation10]   ;;  %s478_s3 = int_to_ptr.vmem [resolvable:$true] %s477_s3 }
  0x1e   :  { %183 = vmatpush.bf16.msra.mxu1 %v522_v14  ;;  %v222_v35 = vperm.slane %v192_v34, 1  ;;  %v204_v36 = vperm.slane %v192_v34, 0  ;;  %v244_v37 = vperm.slane %v192_v34, 2  ;;  %v223_v38 = vperm.slane %v192_v34, 5  ;;  %v258_v52 = vld [vmem:[%s916_s4] sm:$0x3] }
  0x1f   :  { %v205_v39 = vperm.slane %v192_v34, 4  ;;  %v245_v40 = vperm.slane %v192_v34, 6  ;;  %v260_v59 = vperm.slane %v258_v52, 0  ;;  %v261_v61 = vperm.slane %v258_v52, 1  ;;  %s464_s29 = sshll.u32 %s782_s2, 4  ;;  %s466_s12 = sshll.u32 %s921_s9, 4  ;;  %s465_s29 = int_to_ptr.vmem [resolvable:$true] %s464_s29  ;;  %s467_s12 = int_to_ptr.hbm [resolvable:$true] %s466_s12 }
  0x20   :  { %v226_v41 = vperm.slane %v222_v35, 1  ;;  %v208_v42 = vperm.slane %v204_v36, 0  ;;  %v248_v43 = vperm.slane %v244_v37, 2  ;;  %v227_v44 = vperm.slane %v223_v38, 1 }
  0x21   :  { %170 = vmatpush.bf16.msra.mxu0 %v510_v22  ;;  %v209_v46 = vperm.slane %v205_v39, 0  ;;  %v249_v47 = vperm.slane %v245_v40, 2 }
  0x22   :  { %184 = vmatpush.bf16.msra.mxu1 %v514_v23  ;;  %v871_v31 = vld [vmem:[#allocation11] sm:$0xff] }
  0x23   :  { %v873_v32 = vld [vmem:[#allocation11 + $0x8] sm:$0xff] }
  0x24   :  { %v111_v33 = vpack.c.bf16 %v873_v32, %v871_v31  ;;  %219 = vperm.xlu1 %599, %v110_v30   ;;  %200 = vperm.xlu0 %598, %v110_v30  }
  0x25   :  { %171 = vmatpush.bf16.msra.mxu0 %v502_v28  ;;  %241 = vperm.xlu2 %600, %v110_v30  }
  0x26   :  { %185 = vmatpush.bf16.msra.mxu1 %v506_v29 }
  0x28   :  { %531 = vmatmul.msk.bf16.vlgmr.msra.gmra.mxu0 %vm104_vm0, %v111_v33 }
  0x29   :  { %532 = vmatmul.msk.bf16.vlgmr.msra.gmra.mxu1 %vm104_vm0, %v111_v33 }
  0x2c   :  { %601 = vset.pattern.permute.xlu0 %v780_v2 }
  0x77   :  { %v238_v51 = vpop.permute.xlu2 %237 }
  0x78   :  { %v250_v55 = vmul.f32 %v248_v43, %v238_v51  ;;  %v251_v56 = vmul.f32 %v249_v47, %v238_v51 }
  0x7f   :  { %v242_v5 = vpop.permute.xlu2 %241 }
  0x80   :  { %v253_v7 = vmul.f32 %v249_v47, %v242_v5  ;;  %v252_v16 = vmul.f32 %v248_v43, %v242_v5 }
  0x8e   :  { %v216_v45 = vpop.permute.xlu1 %215  ;;  %v196_v50 = vpop.permute.xlu0 %195 }
  0x8f   :  { %v228_v48 = vmul.f32 %v226_v41, %v216_v45  ;;  %v229_v49 = vmul.f32 %v227_v44, %v216_v45  ;;  %v210_v53 = vmul.f32 %v208_v42, %v196_v50  ;;  %v211_v54 = vmul.f32 %v209_v46, %v196_v50 }
  0x91   :  { %v232_v57 = vadd.f32 %v228_v48, %v210_v53  ;;  %v233_v58 = vadd.f32 %v229_v49, %v211_v54 }
  0x93   :  { %v254_v60 = vadd.f32 %v250_v55, %v232_v57  ;;  %v255_v62 = vadd.f32 %v251_v56, %v233_v58 }
  0x95   :  { %v264_v63 = vadd.f32 %v260_v59, %v254_v60  ;;  %v265_v0 = vadd.f32 %v261_v61, %v255_v62  ;;  %v580_v60 = vld [vmem:[#allocation7 + $0x18] sm:$0xff]  ;;  %v578_v62 = vld [vmem:[#allocation7 + $0x8] sm:$0xff] }
  0x96   :  { %v220_v1 = vpop.permute.xlu1 %219  ;;  %v201_v2 = vpop.permute.xlu0 %200  ;;  %392 = vmatpush.bf16.msra.mxu2 %v580_v60 }
  0x97   :  { %320 = vrot.lane.b32.xlu2 %v265_v0, %s775_s11  ;;  %v231_v3 = vmul.f32 %v227_v44, %v220_v1  ;;  %v213_v4 = vmul.f32 %v209_v46, %v201_v2  ;;  %v230_v12 = vmul.f32 %v226_v41, %v220_v1  ;;  %v212_v13 = vmul.f32 %v208_v42, %v201_v2 }
  0x99   :  { %v235_v6 = vadd.f32 %v231_v3, %v213_v4  ;;  %v234_v15 = vadd.f32 %v230_v12, %v212_v13  ;;  %v583_v12 = vld [vmem:[#allocation8 + $0x10] sm:$0xff]  ;;  %v581_v13 = vld [vmem:[#allocation8] sm:$0xff] }
  0x9b   :  { %v257_v9 = vadd.f32 %v253_v7, %v235_v6  ;;  %v256_v18 = vadd.f32 %v252_v16, %v234_v15 }
  0x9d   :  { %v267_v10 = vadd.f32 %v261_v61, %v257_v9  ;;  %v266_v20 = vadd.f32 %v260_v59, %v256_v18  ;;  %v579_v61 = vld [vmem:[#allocation7 + $0x10] sm:$0xff] }
  0x9e   :  { %393 = vmatpush.bf16.msra.mxu2 %v579_v61 }
  0xa2   :  { %394 = vmatpush.bf16.msra.mxu2 %v578_v62 }
  0xa5   :  { %v173_v14 = vpop.f32.mrf.mxu0 }
  0xa6   :  { %v187_v8 = vpop.f32.mrf.mxu1  ;;  %v268_v17 = vadd.f32 %v264_v63, %v173_v14  ;;  %v577_v63 = vld [vmem:[#allocation7] sm:$0xff] }
  0xa7   :  { %310 = vrot.lane.b32.xlu0 %v187_v8, %s775_s11  ;;  %395 = vmatpush.bf16.msra.mxu2 %v577_v63 }
  0xa8   :  { %v533_v19 = vmul.f32 -1.442695, %v268_v17 }
  0xaa   :  { %604 = vpow2.f32 %v533_v19 }
  0xad   :  { %v175_v21 = vpop.f32.mrf.mxu0 }
  0xae   :  { %v189_v11 = vpop.f32.mrf.mxu1  ;;  %v269_v22 = vadd.f32 %v266_v20, %v175_v21  ;;  %v603_v21 = vld [vmem:[%s920_s8] ss:$0 sm:$0xff] }
  0xaf   :  { %312 = vrot.lane.b32.xlu1 %v189_v11, %s775_s11  ;;  %322 = vrot.lane.b32.xlu0 %v267_v10, %s775_s11  ;;  %v584_v11 = vld [vmem:[#allocation8 + $0x18] sm:$0xff] }
  0xb0   :  { %v534_v23 = vmul.f32 -1.442695, %v269_v22  ;;  %v605_v24 = vpop.eup %604  ;;  %448 = vmatpush.bf16.msra.mxu3 %v584_v11 }
  0xb1   :  { %v276_v25 = vadd.f32 1.0, %v605_v24 }
  0xb2   :  { %606 = vpow2.f32 %v534_v23 }
  0xb3   :  { %608 = vrcp.f32 %v276_v25  ;;  %vm283_vm1 = vweird.f32 %v276_v25  ;;  %v289_v36 = vand.u32 2147483648, %v276_v25  ;;  %v287_v38 = vand.u32 2147483647, %v276_v25 }
  0xb4   :  { %449 = vmatpush.bf16.msra.mxu3 %v583_v12 }
  0xb5   :  { %v290_v40 = vor.u32 1.1754944e-38, %v289_v36  ;;  %vm288_vm4 = vcmp.eq.f32.partialorder %v287_v38, 8.507059e+37 }
  0xb8   :  { %v607_v26 = vpop.eup %606 }
  0xb9   :  { %v277_v27 = vadd.f32 1.0, %v607_v26  ;;  %v609_v28 = vpop.eup %608 }
  0xba   :  { %v279_v29 = vmul.f32 %v609_v28, %v276_v25  ;;  %vm284_vm2 = vweird.f32 %v609_v28 }
  0xbb   :  { %610 = vrcp.f32 %v277_v27  ;;  %vm285_vm3 = vmor %vm283_vm1, %vm284_vm2  ;;  %vm298_vm5 = vweird.f32 %v277_v27  ;;  %v304_v48 = vand.u32 2147483648, %v277_v27  ;;  %v302_v50 = vand.u32 2147483647, %v277_v27 }
  0xbc   :  { %v280_v30 = vsub.f32 1.0, %v279_v29 }
  0xbd   :  { %v305_v52 = vor.u32 1.1754944e-38, %v304_v48  ;;  %vm303_vm8 = vcmp.eq.f32.partialorder %v302_v50, 8.507059e+37 }
  0xbe   :  { %v281_v34 = vmul.f32 %v609_v28, %v280_v30 }
  0xc0   :  { %v282_v37 = vadd.f32 %v609_v28, %v281_v34 }
  0xc1   :  { %v611_v33 = vpop.eup %610 }
  0xc2   :  { %v294_v35 = vmul.f32 %v611_v33, %v277_v27  ;;  %v286_v41 = vsel %vm285_vm3, %v609_v28, %v282_v37  ;;  %vm299_vm6 = vweird.f32 %v611_v33 }
  0xc3   :  { %v291_v44 = vsel %vm288_vm4, %v290_v40, %v286_v41  ;;  %vm300_vm7 = vmor %vm298_vm5, %vm299_vm6 }
  0xc4   :  { %v295_v39 = vsub.f32 1.0, %v294_v35  ;;  %v332_v5 = vsub.f32 1.0, %v291_v44  ;;  %v330_v7 = vmul.f32 %v291_v44, %v871_v31  ;;  %v602_v31 = vld [vmem:[%s918_s6] ss:$0 sm:$0xff] }
  0xc6   :  { %v296_v42 = vmul.f32 %v611_v33, %v295_v39 }
  0xc8   :  { %v297_v46 = vadd.f32 %v611_v33, %v296_v42 }
  0xca   :  { %v301_v51 = vsel %vm300_vm7, %v611_v33, %v297_v46 }
  0xcb   :  { %v306_v54 = vsel %vm303_vm8, %v305_v52, %v301_v51 }
  0xcc   :  { %v333_v0 = vsub.f32 1.0, %v306_v54  ;;  %v331_v2 = vmul.f32 %v306_v54, %v873_v32  ;;  %v582_v32 = vld [vmem:[#allocation8 + $0x8] sm:$0xff] }
  0xcd   :  { %450 = vmatpush.bf16.msra.mxu3 %v582_v32 }
  0xd1   :  { %451 = vmatpush.bf16.msra.mxu3 %v581_v13 }
  0xf1   :  { %v321_v47 = vpop.permute.xlu2 %320 }
 0x119   :  { %v311_v43 = vpop.permute.xlu0 %310 }
 0x11a   :  { %v316_v45 = vmul.f32 %v311_v43, %v291_v44 }
 0x11c   :  { %v326_v49 = vadd.f32 %v321_v47, %v316_v45 }
 0x11e   :  { %612 = vtanh.f32 %v326_v49 }
 0x121   :  { %v313_v53 = vpop.permute.xlu1 %312  ;;  %v323_v55 = vpop.permute.xlu0 %322 }
 0x122   :  { %v317_v56 = vmul.f32 %v313_v53, %v306_v54 }
 0x124   :  { %v613_v57 = vpop.eup %612  ;;  %v327_v58 = vadd.f32 %v323_v55, %v317_v56 }
 0x125   :  { %336 = vrot.lane.b32.xlu1 %v613_v57, %s775_s11 }
 0x126   :  { %614 = vtanh.f32 %v327_v58 }
 0x12c   :  { %v615_v59 = vpop.eup %614 }
 0x12d   :  { %338 = vrot.lane.b32.xlu2 %v615_v59, %s775_s11 }
 0x187   :  { %v339_v1 = vpop.permute.xlu2 %338 }
 0x188   :  { %v343_v3 = vmul.f32 %v339_v1, %v333_v0 }
 0x18a   :  { %v345_v4 = vadd.f32 %v343_v3, %v331_v2 }
 0x18c   :  { %347 = vst.msk [vmem:[#allocation11 + $0x8] sm:$0xff] %vm104_vm0, %v345_v4 }
 0x197   :  { %v337_v6 = vpop.permute.xlu1 %336 }
 0x198   :  { %v342_v8 = vmul.f32 %v337_v6, %v332_v5 }
 0x19a   :  { %v344_v9 = vadd.f32 %v342_v8, %v330_v7 }
 0x19c   :  { %346 = vst.msk [vmem:[#allocation11] sm:$0xff] %vm104_vm0, %v344_v9  ;;  %v348_v10 = vpack.c.bf16 %v345_v4, %v344_v9 }
 0x19d   :  { %485 = dma.vmem_to_hbm [thread:$0]  %s478_s3, 256, %s480_s27, [#allocation12], %s772_s23, %s772_s23, %s773_s24  }
 0x19e   :  { %551 = vmatmul.msk.bf16.vlgmr.msra.gmra.mxu2 %vm104_vm0, %v348_v10 }
 0x221   :  { %v397_v14 = vpop.f32.mrf.mxu2 }
 0x222   :  { %v398_v15 = vadd.f32 %v602_v31, %v397_v14 }
 0x224   :  { %v402_v18 = vmax.f32 %v398_v15, 0.0 }
 0x229   :  { %v399_v16 = vpop.f32.mrf.mxu2 }
 0x22a   :  { %v400_v17 = vadd.f32 %v602_v31, %v399_v16 }
 0x22c   :  { %v403_v19 = vmax.f32 %v400_v17, 0.0 }
 0x22e   :  { %v404_v20 = vpack.c.bf16 %v403_v19, %v402_v18 }
 0x230   :  { %568 = vmatmul.msk.bf16.vlgmr.msra.gmra.mxu3 %vm104_vm0, %v404_v20 }
 0x2b3   :  { %v453_v22 = vpop.f32.mrf.mxu3 }
 0x2b4   :  { %v454_v23 = vadd.f32 %v603_v21, %v453_v22 }
 0x2b6   :  { %458 = vst [vmem:[#allocation10] sm:$0xff] %v454_v23 }
 0x2bb   :  { %v455_v24 = vpop.f32.mrf.mxu3 }
 0x2bc   :  { %v456_v25 = vadd.f32 %v603_v21, %v455_v24 }
 0x2be   :  { %459 = vst [vmem:[#allocation10 + $0x8] sm:$0xff] %v456_v25 }
 0x2bf   :  { %472 = dma.vmem_to_hbm [thread:$0]  %s465_s29, 256, %s467_s12, [#allocation4], %s772_s23, %s772_s23, %s773_s24  }
 0x2c0   :  { %766 = dma.done.wait [#allocation4], 256  }
 0x2c1   :  { %767 = vsyncadd [#allocation4], 4294967040 }
 0x2c2   :  { %768 = dma.done.wait [#allocation12], 256  }
 0x2c3   :  { %769 = vsyncadd [#allocation12], 4294967040 }
 0x2c4   :  { %494 = vsyncpa [#allocation3], 1 }
 0x2c5   :  { %495 = vsyncpa [#allocation6], 1 }
 0x2c6   :  { %496 = vsyncpa [#allocation9], 1 }
 0x2c7   :  { %497 = vsyncpa [#allocation4], 1 }
 0x2c8   :  { %498 = vsyncpa [#allocation12], 1 }

</bundles_post_ra>
